<compile_context>
chip_gen: v7x
topology: tpu7x:2x2x1
jax: 0.10.0
libtpu: 0.0.40
codegen_flags: <defaults>
</compile_context>

<pallas_src>
import math

import jax
import jax.numpy as jnp
from jax.experimental import pallas as pl
from jax.experimental.pallas import tpu as pltpu


# ---------------------------------------------------------------------------
# kernel
# ---------------------------------------------------------------------------
def _flatten_head_kernel(x_ref, w1_ref, b1_ref, w2_ref, b2_ref,
                         w3_ref, b3_ref, w4_ref, b4_ref, o_ref):
    x = x_ref[...].astype(jnp.float32)

    def res_block(x_f32, w_ref, b_ref):
        # bf16 operands -> MXU bf16 path; f32 accumulation.
        h = jnp.dot(x_f32.astype(jnp.bfloat16), w_ref[...],
                    preferred_element_type=jnp.float32) + b_ref[...]
        return jnp.maximum(h, 0.0) + x_f32

    x = res_block(x, w1_ref, b1_ref)
    x = res_block(x, w2_ref, b2_ref)
    x = res_block(x, w3_ref, b3_ref)

    out = jnp.dot(x.astype(jnp.bfloat16), w4_ref[...],
                  preferred_element_type=jnp.float32) + b4_ref[...]
    o_ref[...] = out.astype(o_ref.dtype)


# ---------------------------------------------------------------------------
# helpers
# ---------------------------------------------------------------------------
def _round_up(x, m):
    return ((x + m - 1) // m) * m


def _vmem_capacity_bytes():
    try:
        return int(pltpu.get_tpu_info().vmem_capacity_bytes)
    except Exception:
        return 128 * 1024 * 1024  # v5e / v6e default


def _device_kind():
    try:
        return jax.devices()[0].device_kind.lower()
    except Exception:
        return ""


def _preferred_block_m():
    kind = _device_kind()
    if "v7" in kind:
        return 256   # 64 MiB VMEM: keep row tiles modest
    if "v6" in kind:
        return 512   # 128 MiB VMEM: larger tiles amortize per-step overhead
    if "v5" in kind or "v4" in kind or "v3" in kind:
        return 256
    return 256


def _pick_block_m(M, nf_pad, tw_pad, x_itemsize, out_itemsize,
                  resident_bytes, vmem_budget):
    """Largest row tile that fits VMEM, with >=2 (even) grid steps when M allows."""
    pref = _preferred_block_m()
    per_row = (2 * nf_pad * x_itemsize          # double-buffered x tile
               + 2 * tw_pad * out_itemsize      # double-buffered out tile
               + 4 * max(nf_pad, tw_pad) * 4)   # f32 intermediates headroom
    avail = vmem_budget - resident_bytes
    if avail < per_row * 16:
        return None  # resident weights do not fit -> caller falls back

    cap = max(16, min(pref, (avail // per_row) // 16 * 16))

    if M <= 16:
        # single tiny tile; 8-row granularity keeps the test shapes exact.
        return _round_up(max(M, 8), 8)

    # >=2 grid steps (megacore sharding + DMA/compute pipelining); even step
    # count to avoid a 2-vs-1 core imbalance on v7x.
    n_steps = max(2, pl.cdiv(M, cap))
    if n_steps % 2:
        n_steps += 1
    block_m = min(cap, _round_up(pl.cdiv(M, n_steps), 16))

    # prefer an exact divisor of M (no ragged tail tile) when one is close.
    if M % block_m:
        for cand in range(block_m, max(16, block_m // 2) - 1, -16):
            if M % cand == 0:
                block_m = cand
                break
    return block_m


# ---------------------------------------------------------------------------
# params: prepare once, outside the hot path
# ---------------------------------------------------------------------------
def prepare_flatten_head_params(params):
    """Pre-cast weights to bf16 and pre-pad nf / target_window lanes to
    multiples of 128.  Call once; reuse the result for every forward call
    (avoids re-streaming all f32 weights through a cast on each call)."""
    w1, b1, w2, b2, w3, b3, w4, b4 = params
    nf = w1.shape[0]
    tw = w4.shape[1]
    nf_pad = _round_up(nf, 128)
    tw_pad = _round_up(tw, 128)

    def pad_w(w, rows, cols):
        return jnp.pad(w, ((0, rows - w.shape[0]), (0, cols - w.shape[1])))

    def pad_b(b, cols):
        b = b.reshape(1, -1)
        return jnp.pad(b, ((0, 0), (0, cols - b.shape[1])))

    return dict(
        nf=nf, tw=tw, nf_pad=nf_pad, tw_pad=tw_pad,
        w1=pad_w(w1, nf_pad, nf_pad).astype(jnp.bfloat16),
        w2=pad_w(w2, nf_pad, nf_pad).astype(jnp.bfloat16),
        w3=pad_w(w3, nf_pad, nf_pad).astype(jnp.bfloat16),
        w4=pad_w(w4, nf_pad, tw_pad).astype(jnp.bfloat16),
        b1=pad_b(b1, nf_pad).astype(jnp.float32),
        b2=pad_b(b2, nf_pad).astype(jnp.float32),
        b3=pad_b(b3, nf_pad).astype(jnp.float32),
        b4=pad_b(b4, tw_pad).astype(jnp.float32),
    )


# cached decision: 1 -> pl.Buffered(1) weight specs compiled fine, 0 -> fallback
_WEIGHT_BUFFER_MODE = None


# ---------------------------------------------------------------------------
# wrapper
# ---------------------------------------------------------------------------
def flatten_head(x, params, *, block_m=None):
    """x: [bs, n_vars, d, p] -> out: [bs, n_vars, target_window].

    `params` is either the raw (w1, b1, ..., w4, b4) tuple or the dict from
    prepare_flatten_head_params (preferred: prepare once outside the hot path).
    """
    global _WEIGHT_BUFFER_MODE

    prepared = params if isinstance(params, dict) else prepare_flatten_head_params(params)

    bs, n_vars, d, p = x.shape
    nf = d * p
    assert nf == prepared["nf"], "nf mismatch between x and params"
    tw, nf_pad, tw_pad = prepared["tw"], prepared["nf_pad"], prepared["tw_pad"]
    M = bs * n_vars

    x2d = x.reshape(M, nf)
    if nf_pad != nf:
        # zero-pad hidden lanes to a 128 multiple: lane-dense vld/vst and full
        # MXU K tiles.  Padded lanes stay exactly zero through every residual
        # block because padded weight rows/cols and bias lanes are zero.
        x2d = jnp.pad(x2d, ((0, 0), (0, nf_pad - nf)))

    # --- VMEM accounting (single-buffered weights, double-buffered act tiles).
    capacity = _vmem_capacity_bytes()
    vmem_budget = (capacity * 7) // 8          # headroom for Mosaic scratch
    weight_bytes = (3 * nf_pad * nf_pad + nf_pad * tw_pad) * 2   # bf16
    bias_bytes = (3 * nf_pad + tw_pad) * 4
    resident = weight_bytes + bias_bytes

    if block_m is None:
        block_m = _pick_block_m(M, nf_pad, tw_pad, x2d.dtype.itemsize,
                                x.dtype.itemsize, resident, vmem_budget)

    if block_m is None:
        # Resident-weight design does not fit this generation's VMEM.
        # TODO(synk): K-tiled Pallas fallback; plain XLA path for correctness.
        h = x2d.astype(jnp.float32)
        for wk, bk in (("w1", "b1"), ("w2", "b2"), ("w3", "b3")):
            h = jnp.maximum(h @ prepared[wk].astype(jnp.float32)
                            + prepared[bk], 0.0) + h
        out2d = h @ prepared["w4"].astype(jnp.float32) + prepared["b4"]
        return out2d[:, :tw].astype(x.dtype).reshape(bs, n_vars, tw)

    grid_m = pl.cdiv(M, block_m)

    per_step_bytes = (2 * block_m * nf_pad * x2d.dtype.itemsize
                      + 2 * block_m * tw_pad * x.dtype.itemsize
                      + 4 * block_m * max(nf_pad, tw_pad) * 4)
    needed = resident + per_step_bytes
    vmem_limit = int(min(vmem_budget,
                         max(needed + 16 * 1024 * 1024, 32 * 1024 * 1024)))

    flops = 2 * M * nf_pad * (3 * nf_pad + tw_pad)
    bytes_accessed = (M * nf_pad * x2d.dtype.itemsize + resident
                      + M * tw_pad * x.dtype.itemsize)
    cost = pl.CostEstimate(flops=int(flops), transcendentals=0,
                           bytes_accessed=int(bytes_accessed))

    def _call(weight_buffers):
        if weight_buffers:
            w_kwargs = dict(pipeline_mode=pl.Buffered(weight_buffers))
        else:
            w_kwargs = {}

        def w_spec(shape):
            return pl.BlockSpec(shape, lambda i: (0, 0), **w_kwargs)

        return pl.pallas_call(
            _flatten_head_kernel,
            out_shape=jax.ShapeDtypeStruct((M, tw_pad), x.dtype),
            grid_spec=pltpu.PrefetchScalarGridSpec(
                num_scalar_prefetch=0,
                grid=(grid_m,),
                in_specs=[
                    pl.BlockSpec((block_m, nf_pad), lambda i: (i, 0)),  # x rows
                    w_spec((nf_pad, nf_pad)), w_spec((1, nf_pad)),      # W1, b1
                    w_spec((nf_pad, nf_pad)), w_spec((1, nf_pad)),      # W2, b2
                    w_spec((nf_pad, nf_pad)), w_spec((1, nf_pad)),      # W3, b3
                    w_spec((nf_pad, tw_pad)), w_spec((1, tw_pad)),      # W4, b4
                ],
                out_specs=pl.BlockSpec((block_m, tw_pad), lambda i: (i, 0)),
            ),
            compiler_params=pltpu.CompilerParams(
                dimension_semantics=("parallel",),
                vmem_limit_bytes=vmem_limit),
            cost_estimate=cost,
        )(x2d, prepared["w1"], prepared["b1"], prepared["w2"], prepared["b2"],
          prepared["w3"], prepared["b3"], prepared["w4"], prepared["b4"])

    if _WEIGHT_BUFFER_MODE is None:
        try:
            out_padded = _call(1)   # constant index_map -> single-buffer weights
            _WEIGHT_BUFFER_MODE = 1
        except Exception:
            out_padded = _call(0)   # safety net: default (double) buffering
            _WEIGHT_BUFFER_MODE = 0
    else:
        out_padded = _call(_WEIGHT_BUFFER_MODE)

    return out_padded[:, :tw].reshape(bs, n_vars, tw)


# ---------------------------------------------------------------------------
# params + pure-JAX reference
# ---------------------------------------------------------------------------
def init_params(key, nf, target_window, dtype=jnp.float32):
    """nn.Linear-style init (uniform +-1/sqrt(fan_in)).  Weights stored
    pre-transposed as [in, out]; biases as [1, out]."""
    k = jax.random.split(key, 8)
    bound = 1.0 / math.sqrt(nf)
    w1 = jax.random.uniform(k[0], (nf, nf), dtype, -bound, bound)
    b1 = jax.random.uniform(k[1], (1, nf), dtype, -bound, bound)
    w2 = jax.random.uniform(k[2], (nf, nf), dtype, -bound, bound)
    b2 = jax.random.uniform(k[3], (1, nf), dtype, -bound, bound)
    w3 = jax.random.uniform(k[4], (nf, nf), dtype, -bound, bound)
    b3 = jax.random.uniform(k[5], (1, nf), dtype, -bound, bound)
    w4 = jax.random.uniform(k[6], (nf, target_window), dtype, -bound, bound)
    b4 = jax.random.uniform(k[7], (1, target_window), dtype, -bound, bound)
    return (w1, b1, w2, b2, w3, b3, w4, b4)


def reference(x, params):
    w1, b1, w2, b2, w3, b3, w4, b4 = params
    bs, n_vars, d, p = x.shape
    h = x.reshape(bs, n_vars, d * p)
    h = jnp.maximum(h @ w1 + b1, 0.0) + h
    h = jnp.maximum(h @ w2 + b2, 0.0) + h
    h = jnp.maximum(h @ w3 + b3, 0.0) + h
    return h @ w4 + b4


# ---------------------------------------------------------------------------
if __name__ == "__main__":
    key = jax.random.PRNGKey(0)
    kx, kp = jax.random.split(key)

    # small shapes: bs=2, n_vars=4, d=8, p=4 -> nf=32, target_window=16
    bs, n_vars, d, p = 2, 4, 8, 4
    nf = d * p
    target_window = 16

    x = jax.random.normal(kx, (bs, n_vars, d, p), jnp.float32)
    params = init_params(kp, nf, target_window)

    # prepare once (bf16 cast + 128-lane padding hoisted out of the hot path)
    prepared = prepare_flatten_head_params(params)

    out = flatten_head(x, prepared)
    out = jax.block_until_ready(out)

    ref = reference(x, params)
    assert out.shape == (bs, n_vars, target_window)
    # bf16 MXU operands (f32 accumulation) vs the pure-f32 reference; error
    # grows roughly with sqrt(nf), tolerance chosen for the small test nf.
    assert jnp.allclose(out, ref, atol=5e-2, rtol=5e-2), "mismatch vs reference"

    print("KERNEL_OK")
</pallas_src>

<mosaic_0001>
module attributes {stable_mosaic.version = 11 : i64} {
  func.func @_flatten_head_kernel(%arg0: i32, %arg1: memref<8x128xf32, #tpu.memory_space<vmem>>, %arg2: memref<128x128xbf16, #tpu.memory_space<vmem>>, %arg3: memref<1x128xf32, #tpu.memory_space<vmem>>, %arg4: memref<128x128xbf16, #tpu.memory_space<vmem>>, %arg5: memref<1x128xf32, #tpu.memory_space<vmem>>, %arg6: memref<128x128xbf16, #tpu.memory_space<vmem>>, %arg7: memref<1x128xf32, #tpu.memory_space<vmem>>, %arg8: memref<128x128xbf16, #tpu.memory_space<vmem>>, %arg9: memref<1x128xf32, #tpu.memory_space<vmem>>, %arg10: memref<8x128xf32, #tpu.memory_space<vmem>>) attributes {dimension_semantics = [#tpu.dimension_semantics<parallel>], iteration_bounds = array<i64: 1>, scalar_prefetch = 0 : i64, scratch_operands = 0 : i64, tpu.core_type = #tpu.core_type<tc>, window_params = [{transform_indices = @transform_0, window_bounds = array<i64: 8, 128>}, {pipeline_mode = #tpu.pipeline_mode<synchronous>, transform_indices = @transform_1, window_bounds = array<i64: 128, 128>}, {pipeline_mode = #tpu.pipeline_mode<synchronous>, transform_indices = @transform_2, window_bounds = array<i64: 1, 128>}, {pipeline_mode = #tpu.pipeline_mode<synchronous>, transform_indices = @transform_3, window_bounds = array<i64: 128, 128>}, {pipeline_mode = #tpu.pipeline_mode<synchronous>, transform_indices = @transform_4, window_bounds = array<i64: 1, 128>}, {pipeline_mode = #tpu.pipeline_mode<synchronous>, transform_indices = @transform_5, window_bounds = array<i64: 128, 128>}, {pipeline_mode = #tpu.pipeline_mode<synchronous>, transform_indices = @transform_6, window_bounds = array<i64: 1, 128>}, {pipeline_mode = #tpu.pipeline_mode<synchronous>, transform_indices = @transform_7, window_bounds = array<i64: 128, 128>}, {pipeline_mode = #tpu.pipeline_mode<synchronous>, transform_indices = @transform_8, window_bounds = array<i64: 1, 128>}, {transform_indices = @transform_9, window_bounds = array<i64: 8, 128>}]} {
    %c0 = arith.constant 0 : index
    %c0_0 = arith.constant 0 : index
    %0 = vector.load %arg1[%c0, %c0_0] : memref<8x128xf32, #tpu.memory_space<vmem>>, vector<8x128xf32>
    %1 = arith.truncf %0 : vector<8x128xf32> to vector<8x128xbf16>
    %c0_1 = arith.constant 0 : index
    %c0_2 = arith.constant 0 : index
    %2 = vector.load %arg2[%c0_1, %c0_2] : memref<128x128xbf16, #tpu.memory_space<vmem>>, vector<128x128xbf16>
    %cst = arith.constant dense<0.000000e+00> : vector<8x128xf32>
    %3 = tpu.matmul %1, %2, %cst {dimension_numbers = #tpu.dot_dimension_numbers<[1], [0], [0], [1], [0, 0, 1, 1], [], []>} : vector<8x128xbf16>, vector<128x128xbf16>, vector<8x128xf32> -> vector<8x128xf32>
    %c0_3 = arith.constant 0 : index
    %c0_4 = arith.constant 0 : index
    %4 = vector.load %arg3[%c0_3, %c0_4] : memref<1x128xf32, #tpu.memory_space<vmem>>, vector<1x128xf32>
    %5 = vector.broadcast %4 : vector<1x128xf32> to vector<8x128xf32>
    %6 = arith.addf %3, %5 : vector<8x128xf32>
    %cst_5 = arith.constant 0.000000e+00 : f32
    %7 = vector.broadcast %cst_5 : f32 to vector<8x128xf32>
    %8 = arith.maximumf %6, %7 : vector<8x128xf32>
    %9 = arith.addf %8, %0 : vector<8x128xf32>
    %10 = arith.truncf %9 : vector<8x128xf32> to vector<8x128xbf16>
    %c0_6 = arith.constant 0 : index
    %c0_7 = arith.constant 0 : index
    %11 = vector.load %arg4[%c0_6, %c0_7] : memref<128x128xbf16, #tpu.memory_space<vmem>>, vector<128x128xbf16>
    %cst_8 = arith.constant dense<0.000000e+00> : vector<8x128xf32>
    %12 = tpu.matmul %10, %11, %cst_8 {dimension_numbers = #tpu.dot_dimension_numbers<[1], [0], [0], [1], [0, 0, 1, 1], [], []>} : vector<8x128xbf16>, vector<128x128xbf16>, vector<8x128xf32> -> vector<8x128xf32>
    %c0_9 = arith.constant 0 : index
    %c0_10 = arith.constant 0 : index
    %13 = vector.load %arg5[%c0_9, %c0_10] : memref<1x128xf32, #tpu.memory_space<vmem>>, vector<1x128xf32>
    %14 = vector.broadcast %13 : vector<1x128xf32> to vector<8x128xf32>
    %15 = arith.addf %12, %14 : vector<8x128xf32>
    %cst_11 = arith.constant 0.000000e+00 : f32
    %16 = vector.broadcast %cst_11 : f32 to vector<8x128xf32>
    %17 = arith.maximumf %15, %16 : vector<8x128xf32>
    %18 = arith.addf %17, %9 : vector<8x128xf32>
    %19 = arith.truncf %18 : vector<8x128xf32> to vector<8x128xbf16>
    %c0_12 = arith.constant 0 : index
    %c0_13 = arith.constant 0 : index
    %20 = vector.load %arg6[%c0_12, %c0_13] : memref<128x128xbf16, #tpu.memory_space<vmem>>, vector<128x128xbf16>
    %cst_14 = arith.constant dense<0.000000e+00> : vector<8x128xf32>
    %21 = tpu.matmul %19, %20, %cst_14 {dimension_numbers = #tpu.dot_dimension_numbers<[1], [0], [0], [1], [0, 0, 1, 1], [], []>} : vector<8x128xbf16>, vector<128x128xbf16>, vector<8x128xf32> -> vector<8x128xf32>
    %c0_15 = arith.constant 0 : index
    %c0_16 = arith.constant 0 : index
    %22 = vector.load %arg7[%c0_15, %c0_16] : memref<1x128xf32, #tpu.memory_space<vmem>>, vector<1x128xf32>
    %23 = vector.broadcast %22 : vector<1x128xf32> to vector<8x128xf32>
    %24 = arith.addf %21, %23 : vector<8x128xf32>
    %cst_17 = arith.constant 0.000000e+00 : f32
    %25 = vector.broadcast %cst_17 : f32 to vector<8x128xf32>
    %26 = arith.maximumf %24, %25 : vector<8x128xf32>
    %27 = arith.addf %26, %18 : vector<8x128xf32>
    %28 = arith.truncf %27 : vector<8x128xf32> to vector<8x128xbf16>
    %c0_18 = arith.constant 0 : index
    %c0_19 = arith.constant 0 : index
    %29 = vector.load %arg8[%c0_18, %c0_19] : memref<128x128xbf16, #tpu.memory_space<vmem>>, vector<128x128xbf16>
    %cst_20 = arith.constant dense<0.000000e+00> : vector<8x128xf32>
    %30 = tpu.matmul %28, %29, %cst_20 {dimension_numbers = #tpu.dot_dimension_numbers<[1], [0], [0], [1], [0, 0, 1, 1], [], []>} : vector<8x128xbf16>, vector<128x128xbf16>, vector<8x128xf32> -> vector<8x128xf32>
    %c0_21 = arith.constant 0 : index
    %c0_22 = arith.constant 0 : index
    %31 = vector.load %arg9[%c0_21, %c0_22] : memref<1x128xf32, #tpu.memory_space<vmem>>, vector<1x128xf32>
    %32 = vector.broadcast %31 : vector<1x128xf32> to vector<8x128xf32>
    %33 = arith.addf %30, %32 : vector<8x128xf32>
    %c0_23 = arith.constant 0 : index
    %c0_24 = arith.constant 0 : index
    %34 = vector.load %arg10[%c0_23, %c0_24] : memref<8x128xf32, #tpu.memory_space<vmem>>, vector<8x128xf32>
    tpu.vector_store %arg10[%c0_23, %c0_24], %33 {strides = array<i32>} : memref<8x128xf32, #tpu.memory_space<vmem>>, vector<8x128xf32>,
    return
  }
  func.func @transform_0(%arg0: i32) -> (i32, i32) {
    %c0_i32 = arith.constant 0 : i32
    %c0_i32_0 = arith.constant 0 : i32
    return %arg0, %c0_i32 : i32, i32
  }
  func.func @transform_1(%arg0: i32) -> (i32, i32) {
    %c0_i32 = arith.constant 0 : i32
    %c0_i32_0 = arith.constant 0 : i32
    %c0_i32_1 = arith.constant 0 : i32
    return %c0_i32, %c0_i32_0 : i32, i32
  }
  func.func @transform_2(%arg0: i32) -> (i32, i32) {
    %c0_i32 = arith.constant 0 : i32
    %c0_i32_0 = arith.constant 0 : i32
    %c0_i32_1 = arith.constant 0 : i32
    return %c0_i32, %c0_i32_0 : i32, i32
  }
  func.func @transform_3(%arg0: i32) -> (i32, i32) {
    %c0_i32 = arith.constant 0 : i32
    %c0_i32_0 = arith.constant 0 : i32
    %c0_i32_1 = arith.constant 0 : i32
    return %c0_i32, %c0_i32_0 : i32, i32
  }
  func.func @transform_4(%arg0: i32) -> (i32, i32) {
    %c0_i32 = arith.constant 0 : i32
    %c0_i32_0 = arith.constant 0 : i32
    %c0_i32_1 = arith.constant 0 : i32
    return %c0_i32, %c0_i32_0 : i32, i32
  }
  func.func @transform_5(%arg0: i32) -> (i32, i32) {
    %c0_i32 = arith.constant 0 : i32
    %c0_i32_0 = arith.constant 0 : i32
    %c0_i32_1 = arith.constant 0 : i32
    return %c0_i32, %c0_i32_0 : i32, i32
  }
  func.func @transform_6(%arg0: i32) -> (i32, i32) {
    %c0_i32 = arith.constant 0 : i32
    %c0_i32_0 = arith.constant 0 : i32
    %c0_i32_1 = arith.constant 0 : i32
    return %c0_i32, %c0_i32_0 : i32, i32
  }
  func.func @transform_7(%arg0: i32) -> (i32, i32) {
    %c0_i32 = arith.constant 0 : i32
    %c0_i32_0 = arith.constant 0 : i32
    %c0_i32_1 = arith.constant 0 : i32
    return %c0_i32, %c0_i32_0 : i32, i32
  }
  func.func @transform_8(%arg0: i32) -> (i32, i32) {
    %c0_i32 = arith.constant 0 : i32
    %c0_i32_0 = arith.constant 0 : i32
    %c0_i32_1 = arith.constant 0 : i32
    return %c0_i32, %c0_i32_0 : i32, i32
  }
  func.func @transform_9(%arg0: i32) -> (i32, i32) {
    %c0_i32 = arith.constant 0 : i32
    %c0_i32_0 = arith.constant 0 : i32
    return %arg0, %c0_i32 : i32, i32
  }
}

module attributes {stable_mosaic.version = 11 : i64} {
  func.func @_flatten_head_kernel(%arg0: i32, %arg1: memref<8x128xf32, #tpu.memory_space<vmem>>, %arg2: memref<128x128xbf16, #tpu.memory_space<vmem>>, %arg3: memref<1x128xf32, #tpu.memory_space<vmem>>, %arg4: memref<128x128xbf16, #tpu.memory_space<vmem>>, %arg5: memref<1x128xf32, #tpu.memory_space<vmem>>, %arg6: memref<128x128xbf16, #tpu.memory_space<vmem>>, %arg7: memref<1x128xf32, #tpu.memory_space<vmem>>, %arg8: memref<128x128xbf16, #tpu.memory_space<vmem>>, %arg9: memref<1x128xf32, #tpu.memory_space<vmem>>, %arg10: memref<8x128xf32, #tpu.memory_space<vmem>>) attributes {dimension_semantics = [#tpu.dimension_semantics<parallel>], iteration_bounds = array<i64: 1>, scalar_prefetch = 0 : i64, scratch_operands = 0 : i64, tpu.core_type = #tpu.core_type<tc>, window_params = [{transform_indices = @transform_0, window_bounds = array<i64: 8, 128>}, {pipeline_mode = #tpu.pipeline_mode<synchronous>, transform_indices = @transform_1, window_bounds = array<i64: 128, 128>}, {pipeline_mode = #tpu.pipeline_mode<synchronous>, transform_indices = @transform_2, window_bounds = array<i64: 1, 128>}, {pipeline_mode = #tpu.pipeline_mode<synchronous>, transform_indices = @transform_3, window_bounds = array<i64: 128, 128>}, {pipeline_mode = #tpu.pipeline_mode<synchronous>, transform_indices = @transform_4, window_bounds = array<i64: 1, 128>}, {pipeline_mode = #tpu.pipeline_mode<synchronous>, transform_indices = @transform_5, window_bounds = array<i64: 128, 128>}, {pipeline_mode = #tpu.pipeline_mode<synchronous>, transform_indices = @transform_6, window_bounds = array<i64: 1, 128>}, {pipeline_mode = #tpu.pipeline_mode<synchronous>, transform_indices = @transform_7, window_bounds = array<i64: 128, 128>}, {pipeline_mode = #tpu.pipeline_mode<synchronous>, transform_indices = @transform_8, window_bounds = array<i64: 1, 128>}, {transform_indices = @transform_9, window_bounds = array<i64: 8, 128>}]} {
    %c0 = arith.constant 0 : index
    %c0_0 = arith.constant 0 : index
    %0 = vector.load %arg1[%c0, %c0_0] : memref<8x128xf32, #tpu.memory_space<vmem>>, vector<8x128xf32>
    %1 = arith.truncf %0 : vector<8x128xf32> to vector<8x128xbf16>
    %c0_1 = arith.constant 0 : index
    %c0_2 = arith.constant 0 : index
    %2 = vector.load %arg2[%c0_1, %c0_2] : memref<128x128xbf16, #tpu.memory_space<vmem>>, vector<128x128xbf16>
    %cst = arith.constant dense<0.000000e+00> : vector<8x128xf32>
    %3 = tpu.matmul %1, %2, %cst {dimension_numbers = #tpu.dot_dimension_numbers<[1], [0], [0], [1], [0, 0, 1, 1], [], []>} : vector<8x128xbf16>, vector<128x128xbf16>, vector<8x128xf32> -> vector<8x128xf32>
    %c0_3 = arith.constant 0 : index
    %c0_4 = arith.constant 0 : index
    %4 = vector.load %arg3[%c0_3, %c0_4] : memref<1x128xf32, #tpu.memory_space<vmem>>, vector<1x128xf32>
    %5 = vector.broadcast %4 : vector<1x128xf32> to vector<8x128xf32>
    %6 = arith.addf %3, %5 : vector<8x128xf32>
    %cst_5 = arith.constant 0.000000e+00 : f32
    %7 = vector.broadcast %cst_5 : f32 to vector<8x128xf32>
    %8 = arith.maximumf %6, %7 : vector<8x128xf32>
    %9 = arith.addf %8, %0 : vector<8x128xf32>
    %10 = arith.truncf %9 : vector<8x128xf32> to vector<8x128xbf16>
    %c0_6 = arith.constant 0 : index
    %c0_7 = arith.constant 0 : index
    %11 = vector.load %arg4[%c0_6, %c0_7] : memref<128x128xbf16, #tpu.memory_space<vmem>>, vector<128x128xbf16>
    %cst_8 = arith.constant dense<0.000000e+00> : vector<8x128xf32>
    %12 = tpu.matmul %10, %11, %cst_8 {dimension_numbers = #tpu.dot_dimension_numbers<[1], [0], [0], [1], [0, 0, 1, 1], [], []>} : vector<8x128xbf16>, vector<128x128xbf16>, vector<8x128xf32> -> vector<8x128xf32>
    %c0_9 = arith.constant 0 : index
    %c0_10 = arith.constant 0 : index
    %13 = vector.load %arg5[%c0_9, %c0_10] : memref<1x128xf32, #tpu.memory_space<vmem>>, vector<1x128xf32>
    %14 = vector.broadcast %13 : vector<1x128xf32> to vector<8x128xf32>
    %15 = arith.addf %12, %14 : vector<8x128xf32>
    %cst_11 = arith.constant 0.000000e+00 : f32
    %16 = vector.broadcast %cst_11 : f32 to vector<8x128xf32>
    %17 = arith.maximumf %15, %16 : vector<8x128xf32>
    %18 = arith.addf %17, %9 : vector<8x128xf32>
    %19 = arith.truncf %18 : vector<8x128xf32> to vector<8x128xbf16>
    %c0_12 = arith.constant 0 : index
    %c0_13 = arith.constant 0 : index
    %20 = vector.load %arg6[%c0_12, %c0_13] : memref<128x128xbf16, #tpu.memory_space<vmem>>, vector<128x128xbf16>
    %cst_14 = arith.constant dense<0.000000e+00> : vector<8x128xf32>
    %21 = tpu.matmul %19, %20, %cst_14 {dimension_numbers = #tpu.dot_dimension_numbers<[1], [0], [0], [1], [0, 0, 1, 1], [], []>} : vector<8x128xbf16>, vector<128x128xbf16>, vector<8x128xf32> -> vector<8x128xf32>
    %c0_15 = arith.constant 0 : index
    %c0_16 = arith.constant 0 : index
    %22 = vector.load %arg7[%c0_15, %c0_16] : memref<1x128xf32, #tpu.memory_space<vmem>>, vector<1x128xf32>
    %23 = vector.broadcast %22 : vector<1x128xf32> to vector<8x128xf32>
    %24 = arith.addf %21, %23 : vector<8x128xf32>
    %cst_17 = arith.constant 0.000000e+00 : f32
    %25 = vector.broadcast %cst_17 : f32 to vector<8x128xf32>
    %26 = arith.maximumf %24, %25 : vector<8x128xf32>
    %27 = arith.addf %26, %18 : vector<8x128xf32>
    %28 = arith.truncf %27 : vector<8x128xf32> to vector<8x128xbf16>
    %c0_18 = arith.constant 0 : index
    %c0_19 = arith.constant 0 : index
    %29 = vector.load %arg8[%c0_18, %c0_19] : memref<128x128xbf16, #tpu.memory_space<vmem>>, vector<128x128xbf16>
    %cst_20 = arith.constant dense<0.000000e+00> : vector<8x128xf32>
    %30 = tpu.matmul %28, %29, %cst_20 {dimension_numbers = #tpu.dot_dimension_numbers<[1], [0], [0], [1], [0, 0, 1, 1], [], []>} : vector<8x128xbf16>, vector<128x128xbf16>, vector<8x128xf32> -> vector<8x128xf32>
    %c0_21 = arith.constant 0 : index
    %c0_22 = arith.constant 0 : index
    %31 = vector.load %arg9[%c0_21, %c0_22] : memref<1x128xf32, #tpu.memory_space<vmem>>, vector<1x128xf32>
    %32 = vector.broadcast %31 : vector<1x128xf32> to vector<8x128xf32>
    %33 = arith.addf %30, %32 : vector<8x128xf32>
    %c0_23 = arith.constant 0 : index
    %c0_24 = arith.constant 0 : index
    %34 = vector.load %arg10[%c0_23, %c0_24] : memref<8x128xf32, #tpu.memory_space<vmem>>, vector<8x128xf32>
    tpu.vector_store %arg10[%c0_23, %c0_24], %33 {strides = array<i32>} : memref<8x128xf32, #tpu.memory_space<vmem>>, vector<8x128xf32>,
    return
  }
  func.func @transform_0(%arg0: i32) -> (i32, i32) {
    %c0_i32 = arith.constant 0 : i32
    %c0_i32_0 = arith.constant 0 : i32
    return %arg0, %c0_i32 : i32, i32
  }
  func.func @transform_1(%arg0: i32) -> (i32, i32) {
    %c0_i32 = arith.constant 0 : i32
    %c0_i32_0 = arith.constant 0 : i32
    %c0_i32_1 = arith.constant 0 : i32
    return %c0_i32, %c0_i32_0 : i32, i32
  }
  func.func @transform_2(%arg0: i32) -> (i32, i32) {
    %c0_i32 = arith.constant 0 : i32
    %c0_i32_0 = arith.constant 0 : i32
    %c0_i32_1 = arith.constant 0 : i32
    return %c0_i32, %c0_i32_0 : i32, i32
  }
  func.func @transform_3(%arg0: i32) -> (i32, i32) {
    %c0_i32 = arith.constant 0 : i32
    %c0_i32_0 = arith.constant 0 : i32
    %c0_i32_1 = arith.constant 0 : i32
    return %c0_i32, %c0_i32_0 : i32, i32
  }
  func.func @transform_4(%arg0: i32) -> (i32, i32) {
    %c0_i32 = arith.constant 0 : i32
    %c0_i32_0 = arith.constant 0 : i32
    %c0_i32_1 = arith.constant 0 : i32
    return %c0_i32, %c0_i32_0 : i32, i32
  }
  func.func @transform_5(%arg0: i32) -> (i32, i32) {
    %c0_i32 = arith.constant 0 : i32
    %c0_i32_0 = arith.constant 0 : i32
    %c0_i32_1 = arith.constant 0 : i32
    return %c0_i32, %c0_i32_0 : i32, i32
  }
  func.func @transform_6(%arg0: i32) -> (i32, i32) {
    %c0_i32 = arith.constant 0 : i32
    %c0_i32_0 = arith.constant 0 : i32
    %c0_i32_1 = arith.constant 0 : i32
    return %c0_i32, %c0_i32_0 : i32, i32
  }
  func.func @transform_7(%arg0: i32) -> (i32, i32) {
    %c0_i32 = arith.constant 0 : i32
    %c0_i32_0 = arith.constant 0 : i32
    %c0_i32_1 = arith.constant 0 : i32
    return %c0_i32, %c0_i32_0 : i32, i32
  }
  func.func @transform_8(%arg0: i32) -> (i32, i32) {
    %c0_i32 = arith.constant 0 : i32
    %c0_i32_0 = arith.constant 0 : i32
    %c0_i32_1 = arith.constant 0 : i32
    return %c0_i32, %c0_i32_0 : i32, i32
  }
  func.func @transform_9(%arg0: i32) -> (i32, i32) {
    %c0_i32 = arith.constant 0 : i32
    %c0_i32_0 = arith.constant 0 : i32
    return %arg0, %c0_i32 : i32, i32
  }
}

</mosaic_0001>

<bundles_post_ra>
// kernel: tpu_custom_call.1
= control target key start
LH: loop header
LB: loop body
LE: loop exit
PB: predicated region body
PF: predicated region fallthrough
CT: control target
= control target key end

     0   :  { %14 = vsyncpa [#allocation3], 0  ;;  %s1103_s0 = inlined_call_operand.hbm [shape: f32[8,128], index: 0, kind: input, shape index: {}]   ;;  %s1104_s1 = inlined_call_operand.hbm [shape: bf16[128,128], index: 1, kind: input, shape index: {}]   ;;  %s1105_s2 = inlined_call_operand.vmem [shape: f32[1,128], index: 2, kind: input, shape index: {}]   ;;  %s1106_s3 = inlined_call_operand.hbm [shape: bf16[128,128], index: 3, kind: input, shape index: {}]   ;;  %s1107_s4 = inlined_call_operand.vmem [shape: f32[1,128], index: 4, kind: input, shape index: {}]   ;;  %s1108_s5 = inlined_call_operand.hbm [shape: bf16[128,128], index: 5, kind: input, shape index: {}]   ;;  %s1109_s6 = inlined_call_operand.vmem [shape: f32[1,128], index: 6, kind: input, shape index: {}]   ;;  %s1110_s7 = inlined_call_operand.hbm [shape: bf16[128,128], index: 7, kind: input, shape index: {}]   ;;  %s1111_s8 = inlined_call_operand.vmem [shape: f32[1,128], index: 8, kind: input, shape index: {}]   ;;  %s1112_s9 = inlined_call_operand.hbm [shape: f32[8,128], index: 9, kind: output, shape index: {}]  }
   0x1   :  { %15 = vsyncpa [#allocation6], 0 }
   0x2   :  { %16 = vsyncpa [#allocation9], 0 }
   0x3   :  { %17 = vsyncpa [#allocation4], 0  ;;  %s907_s30 = smov [#allocation5]   ;;  %s767_s13 = scalar_lea.hbm %s1104_s1, 1024 }
   0x4   :  { %s33_s10 = sshll.u32 %s907_s30, 4  ;;  %p768_p0 = scmp.ne.s32.totalorder %s1104_s1, %s767_s13  ;;  %s34_s10 = int_to_ptr.vmem [resolvable:$true] %s33_s10 }
   0x5   :  { %p771_p1 = scmp.lt.u32.totalorder %s767_s13, %s1104_s1 }
   0x7   :  { %p773_p2 = pnand %p771_p1, %p768_p0 }
   0x9   :  { %776 = shalt.err (!%p773_p2)
}
   0xa   :  { %s777_s18 = scalar_lea.vmem %s34_s10, 1024  ;;  %p782_p4 = scmp.lt.s32.totalorder %s34_s10, %s34_s10 }
   0xb   :  { %p778_p3 = scmp.ne.s32.totalorder %s34_s10, %s777_s18  ;;  %p783_p5 = scmp.lt.s32.totalorder %s777_s18, %s777_s18 }
   0xd   :  { %p784_p6 = por %p783_p5, %p782_p4 }
   0xf   :  { %p785_p7 = pnand %p784_p6, %p778_p3 }
  0x11   :  { %788 = shalt.err (!%p785_p7)
}
  0x12   :  { %s908_s19 = smov 64   ;;  %s909_s20 = smov 4  }
  0x13   :  { %39 = dma.hbm_to_vmem [thread:$0]  %s1104_s1, 1024, %s34_s10, [#allocation6], %s908_s19, %s908_s19, %s909_s20  }
  0x14   :  { %s910_s23 = smov [#allocation8]   ;;  %s911_s25 = smov [#allocation2]  }
  0x15   :  { %s61_s24 = sshll.u32 %s910_s23, 4  ;;  %s24_s26 = sshll.u32 %s911_s25, 4  ;;  %s62_s24 = int_to_ptr.vmem [resolvable:$true] %s61_s24  ;;  %s25_s26 = int_to_ptr.vmem [resolvable:$true] %s24_s26 }
  0x16   :  { %s789_s29 = scalar_lea.hbm %s1108_s5, 1024 }
  0x17   :  { %p790_p8 = scmp.ne.s32.totalorder %s1108_s5, %s789_s29  ;;  %p793_p9 = scmp.lt.u32.totalorder %s789_s29, %s1108_s5 }
  0x19   :  { %p795_p10 = pnand %p793_p9, %p790_p8 }
  0x1b   :  { %798 = shalt.err (!%p795_p10)
}
  0x1c   :  { %s799_s1 = scalar_lea.vmem %s62_s24, 1024  ;;  %p804_p12 = scmp.lt.s32.totalorder %s62_s24, %s62_s24 }
  0x1d   :  { %p800_p11 = scmp.ne.s32.totalorder %s62_s24, %s799_s1  ;;  %p805_p13 = scmp.lt.s32.totalorder %s799_s1, %s799_s1 }
  0x1f   :  { %p806_p0 = por %p805_p13, %p804_p12 }
  0x21   :  { %p807_p1 = pnand %p806_p0, %p800_p11 }
  0x23   :  { %810 = shalt.err (!%p807_p1)
}
  0x24   :  { %67 = dma.hbm_to_vmem [thread:$0]  %s1108_s5, 1024, %s62_s24, [#allocation9], %s908_s19, %s908_s19, %s909_s20  }
  0x25   :  { %s811_s17 = scalar_lea.hbm %s1103_s0, 128 }
  0x26   :  { %p812_p2 = scmp.ne.s32.totalorder %s1103_s0, %s811_s17  ;;  %p815_p3 = scmp.lt.u32.totalorder %s811_s17, %s1103_s0 }
  0x28   :  { %p817_p4 = pnand %p815_p3, %p812_p2 }
  0x2a   :  { %820 = shalt.err (!%p817_p4)
}
  0x2b   :  { %s821_s25 = scalar_lea.vmem %s25_s26, 128  ;;  %p826_p6 = scmp.lt.s32.totalorder %s25_s26, %s25_s26 }
  0x2c   :  { %p822_p5 = scmp.ne.s32.totalorder %s25_s26, %s821_s25  ;;  %p827_p7 = scmp.lt.s32.totalorder %s821_s25, %s821_s25 }
  0x2e   :  { %p828_p8 = por %p827_p7, %p826_p6 }
  0x30   :  { %p829_p9 = pnand %p828_p8, %p822_p5 }
  0x32   :  { %832 = shalt.err (!%p829_p9)
}
  0x33   :  { %27 = dma.hbm_to_vmem [thread:$0]  %s1103_s0, 128, %s25_s26, [#allocation3]  }
  0x34   :  { %s912_s27 = smov [#allocation7]   ;;  %s913_s29 = smov [#allocation10]  }
  0x35   :  { %s47_s28 = sshll.u32 %s912_s27, 4  ;;  %s75_s30 = sshll.u32 %s913_s29, 4  ;;  %s48_s28 = int_to_ptr.vmem [resolvable:$true] %s47_s28  ;;  %s76_s30 = int_to_ptr.vmem [resolvable:$true] %s75_s30 }
  0x36   :  { %s833_s13 = scalar_lea.hbm %s1106_s3, 1024 }
  0x37   :  { %p834_p10 = scmp.ne.s32.totalorder %s1106_s3, %s833_s13  ;;  %p837_p11 = scmp.lt.u32.totalorder %s833_s13, %s1106_s3 }
  0x39   :  { %p839_p12 = pnand %p837_p11, %p834_p10 }
  0x3b   :  { %842 = shalt.err (!%p839_p12)
}
  0x3c   :  { %s843_s0 = scalar_lea.vmem %s48_s28, 1024  ;;  %p848_p0 = scmp.lt.s32.totalorder %s48_s28, %s48_s28 }
  0x3d   :  { %p844_p13 = scmp.ne.s32.totalorder %s48_s28, %s843_s0  ;;  %p849_p1 = scmp.lt.s32.totalorder %s843_s0, %s843_s0 }
  0x3f   :  { %p850_p2 = por %p849_p1, %p848_p0 }
  0x41   :  { %p851_p3 = pnand %p850_p2, %p844_p13 }
  0x43   :  { %854 = shalt.err (!%p851_p3)
}
  0x44   :  { %53 = dma.hbm_to_vmem [thread:$0]  %s1106_s3, 1024, %s48_s28, [#allocation6], %s908_s19, %s908_s19, %s909_s20  }
  0x45   :  { %s855_s21 = scalar_lea.hbm %s1110_s7, 1024 }
  0x46   :  { %p856_p4 = scmp.ne.s32.totalorder %s1110_s7, %s855_s21  ;;  %p859_p5 = scmp.lt.u32.totalorder %s855_s21, %s1110_s7 }
  0x48   :  { %p861_p6 = pnand %p859_p5, %p856_p4 }
  0x4a   :  { %864 = shalt.err (!%p861_p6)
}
  0x4b   :  { %s865_s24 = scalar_lea.vmem %s76_s30, 1024  ;;  %p870_p8 = scmp.lt.s32.totalorder %s76_s30, %s76_s30 }
  0x4c   :  { %p866_p7 = scmp.ne.s32.totalorder %s76_s30, %s865_s24  ;;  %p871_p9 = scmp.lt.s32.totalorder %s865_s24, %s865_s24 }
  0x4e   :  { %p872_p10 = por %p871_p9, %p870_p8 }
  0x50   :  { %p873_p11 = pnand %p872_p10, %p866_p7 }
  0x52   :  { %876 = shalt.err (!%p873_p11)
}
  0x53   :  { %81 = dma.hbm_to_vmem [thread:$0]  %s1110_s7, 1024, %s76_s30, [#allocation9], %s908_s19, %s908_s19, %s909_s20  }
  0x54   :  { %899 = dma.done.wait [#allocation3], 128  }
  0x55   :  { %900 = vsyncadd [#allocation3], 4294967168 }
  0x56   :  { %901 = dma.done.wait [#allocation6], 2048  }
  0x57   :  { %902 = vsyncadd [#allocation6], 4294965248 }
  0x58   :  { %903 = dma.done.wait [#allocation9], 2048  }
  0x59   :  { %904 = vsyncadd [#allocation9], 4294965248  ;;  %v914_v0 = vmov 0.0   ;;  %vm915_vm0 = vmmov 0   ;;  %v735_v1 = vld [vmem:[#allocation5] sm:$0xff]   ;;  %v736_v2 = vld [vmem:[#allocation5 + $0x8] sm:$0xff]  }
  0x5a   :  { %645 = vmatprep.subr.bf16.mxu0 %v914_v0  ;;  %661 = vmatprep.mubr.msk.bf16.mxu0 %vm915_vm0, %v914_v0  ;;  %v737_v3 = vld [vmem:[#allocation5 + $0x10] sm:$0xff]   ;;  %v743_v4 = vld [vmem:[#allocation7] sm:$0xff]   ;;  %v738_v5 = vld [vmem:[#allocation5 + $0x18] sm:$0xff]   ;;  %s916_s11 = smov [#allocation11]  }
  0x5b   :  { %665 = vmatprep.subr.bf16.mxu1 %v914_v0  ;;  %681 = vmatprep.mubr.msk.bf16.mxu1 %vm915_vm0, %v914_v0  ;;  %v744_v6 = vld [vmem:[#allocation7 + $0x8] sm:$0xff]   ;;  %v739_v7 = vld [vmem:[#allocation5 + $0x20] sm:$0xff]   ;;  %v745_v8 = vld [vmem:[#allocation7 + $0x10] sm:$0xff]   ;;  %s562_s12 = sshll.u32 %s916_s11, 4  ;;  %s563_s12 = int_to_ptr.vmem [resolvable:$true] %s562_s12 }
  0x5c   :  { %646 = vmatpush3.bf16.msra.mxu0 %v735_v1  ;;  %666 = vmatpush3.bf16.msra.mxu1 %v743_v4  ;;  %v740_v9 = vld [vmem:[#allocation5 + $0x28] sm:$0xff]   ;;  %v746_v10 = vld [vmem:[#allocation7 + $0x18] sm:$0xff]   ;;  %v741_v11 = vld [vmem:[#allocation5 + $0x30] sm:$0xff]   ;;  %p882_p13 = scmp.lt.s32.totalorder %s563_s12, %s563_s12 }
  0x5d   :  { %647 = vmatprep.subr.bf16.mxu0 %v914_v0  ;;  %667 = vmatprep.subr.bf16.mxu1 %v914_v0  ;;  %v747_v12 = vld [vmem:[#allocation7 + $0x20] sm:$0xff]   ;;  %v742_v13 = vld [vmem:[#allocation5 + $0x38] sm:$0xff]   ;;  %v748_v15 = vld [vmem:[#allocation7 + $0x28] sm:$0xff]  }
  0x5e   :  { %v100_v14 = vld [vmem:[#allocation2] sm:$0xff]  ;;  %v749_v17 = vld [vmem:[#allocation7 + $0x30] sm:$0xff]   ;;  %v751_v19 = vld [vmem:[#allocation8] sm:$0xff]  }
  0x5f   :  { %v101_v16 = vpack.c.bf16 %v100_v14, %v100_v14  ;;  %v750_v18 = vld [vmem:[#allocation7 + $0x38] sm:$0xff]   ;;  %v752_v20 = vld [vmem:[#allocation8 + $0x8] sm:$0xff]   ;;  %v753_v21 = vld [vmem:[#allocation8 + $0x10] sm:$0xff]  }
  0x60   :  { %648 = vmatpush3.bf16.msra.mxu0 %v736_v2  ;;  %668 = vmatpush3.bf16.msra.mxu1 %v744_v6  ;;  %v754_v22 = vld [vmem:[#allocation8 + $0x18] sm:$0xff]   ;;  %v755_v23 = vld [vmem:[#allocation8 + $0x20] sm:$0xff]   ;;  %v756_v24 = vld [vmem:[#allocation8 + $0x28] sm:$0xff]  }
  0x61   :  { %649 = vmatprep.subr.bf16.mxu0 %v914_v0  ;;  %669 = vmatprep.subr.bf16.mxu1 %v914_v0  ;;  %v573_v25 = vld [vmem:[%s1105_s2] ss:$0 sm:$0xff]  ;;  %v757_v34 = vld [vmem:[#allocation8 + $0x30] sm:$0xff]   ;;  %v759_v36 = vld [vmem:[#allocation10] sm:$0xff]  }
  0x62   :  { %v758_v35 = vld [vmem:[#allocation8 + $0x38] sm:$0xff]   ;;  %v760_v37 = vld [vmem:[#allocation10 + $0x8] sm:$0xff]   ;;  %v761_v38 = vld [vmem:[#allocation10 + $0x10] sm:$0xff]  }
  0x63   :  { %v762_v39 = vld [vmem:[#allocation10 + $0x18] sm:$0xff]   ;;  %v763_v40 = vld [vmem:[#allocation10 + $0x20] sm:$0xff]   ;;  %v764_v41 = vld [vmem:[#allocation10 + $0x28] sm:$0xff]  }
  0x64   :  { %650 = vmatpush3.bf16.msra.mxu0 %v737_v3  ;;  %670 = vmatpush3.bf16.msra.mxu1 %v745_v8  ;;  %v582_v42 = vld [vmem:[%s1107_s4] ss:$0 sm:$0xff]  ;;  %v765_v51 = vld [vmem:[#allocation10 + $0x30] sm:$0xff]  }
  0x65   :  { %651 = vmatprep.subr.bf16.mxu0 %v914_v0  ;;  %671 = vmatprep.subr.bf16.mxu1 %v914_v0  ;;  %v766_v52 = vld [vmem:[#allocation10 + $0x38] sm:$0xff]  }
  0x66   :  { %v591_v53 = vld [vmem:[%s1109_s6] ss:$0 sm:$0xff]  ;;  %s877_s6 = scalar_lea.vmem %s563_s12, 128 }
  0x67   :  { %v600_v62 = vld [vmem:[%s1111_s8] ss:$0 sm:$0xff]  ;;  %p878_p12 = scmp.ne.s32.totalorder %s563_s12, %s877_s6  ;;  %p883_p0 = scmp.lt.s32.totalorder %s877_s6, %s877_s6 }
  0x68   :  { %652 = vmatpush3.bf16.msra.mxu0 %v738_v5  ;;  %672 = vmatpush3.bf16.msra.mxu1 %v746_v10 }
  0x69   :  { %653 = vmatprep.subr.bf16.mxu0 %v914_v0  ;;  %673 = vmatprep.subr.bf16.mxu1 %v914_v0  ;;  %p884_p1 = por %p883_p0, %p882_p13 }
  0x6b   :  { %p885_p2 = pnand %p884_p1, %p878_p12 }
  0x6c   :  { %654 = vmatpush3.bf16.msra.mxu0 %v739_v7  ;;  %674 = vmatpush3.bf16.msra.mxu1 %v747_v12 }
  0x6d   :  { %655 = vmatprep.subr.bf16.mxu0 %v914_v0  ;;  %675 = vmatprep.subr.bf16.mxu1 %v914_v0 }
  0x70   :  { %656 = vmatpush3.bf16.msra.mxu0 %v740_v9  ;;  %676 = vmatpush3.bf16.msra.mxu1 %v748_v15 }
  0x71   :  { %657 = vmatprep.subr.bf16.mxu0 %v914_v0  ;;  %677 = vmatprep.subr.bf16.mxu1 %v914_v0 }
  0x74   :  { %658 = vmatpush3.bf16.msra.mxu0 %v741_v11  ;;  %678 = vmatpush3.bf16.msra.mxu1 %v749_v17 }
  0x75   :  { %659 = vmatprep.subr.bf16.mxu0 %v914_v0  ;;  %679 = vmatprep.subr.bf16.mxu1 %v914_v0 }
  0x78   :  { %660 = vmatpush3.bf16.msra.mxu0 %v742_v13  ;;  %680 = vmatpush3.bf16.msra.mxu1 %v750_v18 }
  0x79   :  { %685 = vmatprep.subr.bf16.mxu0 %v914_v0  ;;  %705 = vmatprep.subr.bf16.mxu1 %v914_v0 }
  0x7b   :  { %662 = vmatmul.mubr.bf16.vlgmr.msra.gmra.mrb[0].mxu0 %v101_v16 }
  0x7c   :  { %701 = vmatprep.mubr.msk.bf16.mxu0 %vm915_vm0, %v914_v0  ;;  %686 = vmatpush3.bf16.msra.mxu0 %v751_v19 }
  0x7d   :  { %687 = vmatprep.subr.bf16.mxu0 %v914_v0 }
  0x80   :  { %688 = vmatpush3.bf16.msra.mxu0 %v752_v20 }
  0x81   :  { %689 = vmatprep.subr.bf16.mxu0 %v914_v0 }
  0x84   :  { %690 = vmatpush3.bf16.msra.mxu0 %v753_v21 }
  0x85   :  { %691 = vmatprep.subr.bf16.mxu0 %v914_v0 }
  0x88   :  { %692 = vmatpush3.bf16.msra.mxu0 %v754_v22 }
  0x89   :  { %693 = vmatprep.subr.bf16.mxu0 %v914_v0 }
  0x8c   :  { %694 = vmatpush3.bf16.msra.mxu0 %v755_v23 }
  0x8d   :  { %695 = vmatprep.subr.bf16.mxu0 %v914_v0 }
  0x90   :  { %696 = vmatpush3.bf16.msra.mxu0 %v756_v24 }
  0x91   :  { %697 = vmatprep.subr.bf16.mxu0 %v914_v0 }
  0x94   :  { %698 = vmatpush3.bf16.msra.mxu0 %v757_v34 }
  0x95   :  { %699 = vmatprep.subr.bf16.mxu0 %v914_v0 }
  0x98   :  { %700 = vmatpush3.bf16.msra.mxu0 %v758_v35 }
 0x14e   :  { %v207_v26 = vpop.f32.mrb[0].mxu0 }
 0x14f   :  { %v208_v27 = vadd.f32 %v573_v25, %v207_v26  ;;  %v663_v28 = vpop.f32.mrb[1].mxu0 }
 0x150   :  { %v210_v29 = vpop.f32.mrb[2].mxu0 }
 0x151   :  { %v213_v30 = vmax.f32 %v208_v27, 0.0  ;;  %v664_v31 = vpop.f32.mrb[3].mxu0 }
 0x153   :  { %v214_v32 = vadd.f32 %v213_v30, %v100_v14 }
 0x155   :  { %v215_v33 = vpack.c.bf16 %v214_v32, %v214_v32 }
 0x157   :  { %682 = vmatmul.mubr.bf16.vlgmr.msra.gmra.mrb[0].mxu1 %v215_v33 }
 0x158   :  { %721 = vmatprep.mubr.msk.bf16.mxu1 %vm915_vm0, %v914_v0  ;;  %706 = vmatpush3.bf16.msra.mxu1 %v759_v36 }
 0x159   :  { %707 = vmatprep.subr.bf16.mxu1 %v914_v0 }
 0x15c   :  { %708 = vmatpush3.bf16.msra.mxu1 %v760_v37 }
 0x15d   :  { %709 = vmatprep.subr.bf16.mxu1 %v914_v0 }
 0x160   :  { %710 = vmatpush3.bf16.msra.mxu1 %v761_v38 }
 0x161   :  { %711 = vmatprep.subr.bf16.mxu1 %v914_v0 }
 0x164   :  { %712 = vmatpush3.bf16.msra.mxu1 %v762_v39 }
 0x165   :  { %713 = vmatprep.subr.bf16.mxu1 %v914_v0 }
 0x168   :  { %714 = vmatpush3.bf16.msra.mxu1 %v763_v40 }
 0x169   :  { %715 = vmatprep.subr.bf16.mxu1 %v914_v0 }
 0x16c   :  { %716 = vmatpush3.bf16.msra.mxu1 %v764_v41 }
 0x16d   :  { %717 = vmatprep.subr.bf16.mxu1 %v914_v0 }
 0x170   :  { %718 = vmatpush3.bf16.msra.mxu1 %v765_v51 }
 0x171   :  { %719 = vmatprep.subr.bf16.mxu1 %v914_v0 }
 0x174   :  { %720 = vmatpush3.bf16.msra.mxu1 %v766_v52 }
 0x22a   :  { %v321_v43 = vpop.f32.mrb[0].mxu1 }
 0x22b   :  { %v322_v44 = vadd.f32 %v582_v42, %v321_v43  ;;  %v683_v45 = vpop.f32.mrb[1].mxu1 }
 0x22c   :  { %v324_v46 = vpop.f32.mrb[2].mxu1 }
 0x22d   :  { %v327_v47 = vmax.f32 %v322_v44, 0.0  ;;  %v684_v48 = vpop.f32.mrb[3].mxu1 }
 0x22f   :  { %v328_v49 = vadd.f32 %v327_v47, %v214_v32 }
 0x231   :  { %v329_v50 = vpack.c.bf16 %v328_v49, %v328_v49 }
 0x233   :  { %702 = vmatmul.mubr.bf16.vlgmr.msra.gmra.mrb[4].mxu0 %v329_v50 }
 0x306   :  { %v435_v54 = vpop.f32.mrb[4].mxu0 }
 0x307   :  { %v436_v55 = vadd.f32 %v591_v53, %v435_v54  ;;  %v703_v56 = vpop.f32.mrb[5].mxu0 }
 0x308   :  { %v438_v57 = vpop.f32.mrb[6].mxu0 }
 0x309   :  { %v441_v58 = vmax.f32 %v436_v55, 0.0  ;;  %v704_v59 = vpop.f32.mrb[7].mxu0 }
 0x30b   :  { %v442_v60 = vadd.f32 %v441_v58, %v328_v49 }
 0x30d   :  { %v443_v61 = vpack.c.bf16 %v442_v60, %v442_v60 }
 0x30f   :  { %722 = vmatmul.mubr.bf16.vlgmr.msra.gmra.mrb[4].mxu1 %v443_v61 }
 0x3e2   :  { %v549_v63 = vpop.f32.mrb[4].mxu1 }
 0x3e3   :  { %v550_v0 = vadd.f32 %v600_v62, %v549_v63  ;;  %v723_v1 = vpop.f32.mrb[5].mxu1 }
 0x3e4   :  { %v552_v2 = vpop.f32.mrb[6].mxu1 }
 0x3e5   :  { %555 = vst [vmem:[#allocation11] sm:$0xff] %v550_v0  ;;  %v724_v3 = vpop.f32.mrb[7].mxu1 }
 0x3e6   :  { %888 = shalt.err (!%p885_p2)
}
 0x3e7   :  { %s889_s8 = scalar_lea.hbm %s1112_s9, 128 }
 0x3e8   :  { %p890_p3 = scmp.ne.s32.totalorder %s1112_s9, %s889_s8  ;;  %p893_p4 = scmp.lt.u32.totalorder %s889_s8, %s1112_s9 }
 0x3ea   :  { %p895_p5 = pnand %p893_p4, %p890_p3 }
 0x3ec   :  { %898 = shalt.err (!%p895_p5)
}
 0x3ed   :  { %565 = dma.vmem_to_hbm [thread:$0]  %s563_s12, 128, %s1112_s9, [#allocation4]  }
 0x3ee   :  { %905 = dma.done.wait [#allocation4], 128  }
 0x3ef   :  { %906 = vsyncadd [#allocation4], 4294967168 }
 0x3f0   :  { %569 = vsyncpa [#allocation3], 1 }
 0x3f1   :  { %570 = vsyncpa [#allocation6], 1 }
 0x3f2   :  { %571 = vsyncpa [#allocation9], 1 }
 0x3f3   :  { %572 = vsyncpa [#allocation4], 1 }

// kernel: tpu_custom_call.1
= control target key start
LH: loop header
LB: loop body
LE: loop exit
PB: predicated region body
PF: predicated region fallthrough
CT: control target
= control target key end

     0   :  { %14 = vsyncpa [#allocation3], 0  ;;  %s1103_s0 = inlined_call_operand.hbm [shape: f32[8,128], index: 0, kind: input, shape index: {}]   ;;  %s1104_s1 = inlined_call_operand.hbm [shape: bf16[128,128], index: 1, kind: input, shape index: {}]   ;;  %s1105_s2 = inlined_call_operand.vmem [shape: f32[1,128], index: 2, kind: input, shape index: {}]   ;;  %s1106_s3 = inlined_call_operand.hbm [shape: bf16[128,128], index: 3, kind: input, shape index: {}]   ;;  %s1107_s4 = inlined_call_operand.vmem [shape: f32[1,128], index: 4, kind: input, shape index: {}]   ;;  %s1108_s5 = inlined_call_operand.hbm [shape: bf16[128,128], index: 5, kind: input, shape index: {}]   ;;  %s1109_s6 = inlined_call_operand.vmem [shape: f32[1,128], index: 6, kind: input, shape index: {}]   ;;  %s1110_s7 = inlined_call_operand.hbm [shape: bf16[128,128], index: 7, kind: input, shape index: {}]   ;;  %s1111_s8 = inlined_call_operand.vmem [shape: f32[1,128], index: 8, kind: input, shape index: {}]   ;;  %s1112_s9 = inlined_call_operand.hbm [shape: f32[8,128], index: 9, kind: output, shape index: {}]  }
   0x1   :  { %15 = vsyncpa [#allocation6], 0 }
   0x2   :  { %16 = vsyncpa [#allocation9], 0 }
   0x3   :  { %17 = vsyncpa [#allocation4], 0  ;;  %s907_s30 = smov [#allocation5]   ;;  %s767_s13 = scalar_lea.hbm %s1104_s1, 1024 }
   0x4   :  { %s33_s10 = sshll.u32 %s907_s30, 4  ;;  %p768_p0 = scmp.ne.s32.totalorder %s1104_s1, %s767_s13  ;;  %s34_s10 = int_to_ptr.vmem [resolvable:$true] %s33_s10 }
   0x5   :  { %p771_p1 = scmp.lt.u32.totalorder %s767_s13, %s1104_s1 }
   0x7   :  { %p773_p2 = pnand %p771_p1, %p768_p0 }
   0x9   :  { %776 = shalt.err (!%p773_p2)
}
   0xa   :  { %s777_s18 = scalar_lea.vmem %s34_s10, 1024  ;;  %p782_p4 = scmp.lt.s32.totalorder %s34_s10, %s34_s10 }
   0xb   :  { %p778_p3 = scmp.ne.s32.totalorder %s34_s10, %s777_s18  ;;  %p783_p5 = scmp.lt.s32.totalorder %s777_s18, %s777_s18 }
   0xd   :  { %p784_p6 = por %p783_p5, %p782_p4 }
   0xf   :  { %p785_p7 = pnand %p784_p6, %p778_p3 }
  0x11   :  { %788 = shalt.err (!%p785_p7)
}
  0x12   :  { %s908_s19 = smov 64   ;;  %s909_s20 = smov 4  }
  0x13   :  { %39 = dma.hbm_to_vmem [thread:$0]  %s1104_s1, 1024, %s34_s10, [#allocation6], %s908_s19, %s908_s19, %s909_s20  }
  0x14   :  { %s910_s23 = smov [#allocation8]   ;;  %s911_s25 = smov [#allocation2]  }
  0x15   :  { %s61_s24 = sshll.u32 %s910_s23, 4  ;;  %s24_s26 = sshll.u32 %s911_s25, 4  ;;  %s62_s24 = int_to_ptr.vmem [resolvable:$true] %s61_s24  ;;  %s25_s26 = int_to_ptr.vmem [resolvable:$true] %s24_s26 }
  0x16   :  { %s789_s29 = scalar_lea.hbm %s1108_s5, 1024 }
  0x17   :  { %p790_p8 = scmp.ne.s32.totalorder %s1108_s5, %s789_s29  ;;  %p793_p9 = scmp.lt.u32.totalorder %s789_s29, %s1108_s5 }
  0x19   :  { %p795_p10 = pnand %p793_p9, %p790_p8 }
  0x1b   :  { %798 = shalt.err (!%p795_p10)
}
  0x1c   :  { %s799_s1 = scalar_lea.vmem %s62_s24, 1024  ;;  %p804_p12 = scmp.lt.s32.totalorder %s62_s24, %s62_s24 }
  0x1d   :  { %p800_p11 = scmp.ne.s32.totalorder %s62_s24, %s799_s1  ;;  %p805_p13 = scmp.lt.s32.totalorder %s799_s1, %s799_s1 }
  0x1f   :  { %p806_p0 = por %p805_p13, %p804_p12 }
  0x21   :  { %p807_p1 = pnand %p806_p0, %p800_p11 }
  0x23   :  { %810 = shalt.err (!%p807_p1)
}
  0x24   :  { %67 = dma.hbm_to_vmem [thread:$0]  %s1108_s5, 1024, %s62_s24, [#allocation9], %s908_s19, %s908_s19, %s909_s20  }
  0x25   :  { %s811_s17 = scalar_lea.hbm %s1103_s0, 128 }
  0x26   :  { %p812_p2 = scmp.ne.s32.totalorder %s1103_s0, %s811_s17  ;;  %p815_p3 = scmp.lt.u32.totalorder %s811_s17, %s1103_s0 }
  0x28   :  { %p817_p4 = pnand %p815_p3, %p812_p2 }
  0x2a   :  { %820 = shalt.err (!%p817_p4)
}
  0x2b   :  { %s821_s25 = scalar_lea.vmem %s25_s26, 128  ;;  %p826_p6 = scmp.lt.s32.totalorder %s25_s26, %s25_s26 }
  0x2c   :  { %p822_p5 = scmp.ne.s32.totalorder %s25_s26, %s821_s25  ;;  %p827_p7 = scmp.lt.s32.totalorder %s821_s25, %s821_s25 }
  0x2e   :  { %p828_p8 = por %p827_p7, %p826_p6 }
  0x30   :  { %p829_p9 = pnand %p828_p8, %p822_p5 }
  0x32   :  { %832 = shalt.err (!%p829_p9)
}
  0x33   :  { %27 = dma.hbm_to_vmem [thread:$0]  %s1103_s0, 128, %s25_s26, [#allocation3]  }
  0x34   :  { %s912_s27 = smov [#allocation7]   ;;  %s913_s29 = smov [#allocation10]  }
  0x35   :  { %s47_s28 = sshll.u32 %s912_s27, 4  ;;  %s75_s30 = sshll.u32 %s913_s29, 4  ;;  %s48_s28 = int_to_ptr.vmem [resolvable:$true] %s47_s28  ;;  %s76_s30 = int_to_ptr.vmem [resolvable:$true] %s75_s30 }
  0x36   :  { %s833_s13 = scalar_lea.hbm %s1106_s3, 1024 }
  0x37   :  { %p834_p10 = scmp.ne.s32.totalorder %s1106_s3, %s833_s13  ;;  %p837_p11 = scmp.lt.u32.totalorder %s833_s13, %s1106_s3 }
  0x39   :  { %p839_p12 = pnand %p837_p11, %p834_p10 }
  0x3b   :  { %842 = shalt.err (!%p839_p12)
}
  0x3c   :  { %s843_s0 = scalar_lea.vmem %s48_s28, 1024  ;;  %p848_p0 = scmp.lt.s32.totalorder %s48_s28, %s48_s28 }
  0x3d   :  { %p844_p13 = scmp.ne.s32.totalorder %s48_s28, %s843_s0  ;;  %p849_p1 = scmp.lt.s32.totalorder %s843_s0, %s843_s0 }
  0x3f   :  { %p850_p2 = por %p849_p1, %p848_p0 }
  0x41   :  { %p851_p3 = pnand %p850_p2, %p844_p13 }
  0x43   :  { %854 = shalt.err (!%p851_p3)
}
  0x44   :  { %53 = dma.hbm_to_vmem [thread:$0]  %s1106_s3, 1024, %s48_s28, [#allocation6], %s908_s19, %s908_s19, %s909_s20  }
  0x45   :  { %s855_s21 = scalar_lea.hbm %s1110_s7, 1024 }
  0x46   :  { %p856_p4 = scmp.ne.s32.totalorder %s1110_s7, %s855_s21  ;;  %p859_p5 = scmp.lt.u32.totalorder %s855_s21, %s1110_s7 }
  0x48   :  { %p861_p6 = pnand %p859_p5, %p856_p4 }
  0x4a   :  { %864 = shalt.err (!%p861_p6)
}
  0x4b   :  { %s865_s24 = scalar_lea.vmem %s76_s30, 1024  ;;  %p870_p8 = scmp.lt.s32.totalorder %s76_s30, %s76_s30 }
  0x4c   :  { %p866_p7 = scmp.ne.s32.totalorder %s76_s30, %s865_s24  ;;  %p871_p9 = scmp.lt.s32.totalorder %s865_s24, %s865_s24 }
  0x4e   :  { %p872_p10 = por %p871_p9, %p870_p8 }
  0x50   :  { %p873_p11 = pnand %p872_p10, %p866_p7 }
  0x52   :  { %876 = shalt.err (!%p873_p11)
}
  0x53   :  { %81 = dma.hbm_to_vmem [thread:$0]  %s1110_s7, 1024, %s76_s30, [#allocation9], %s908_s19, %s908_s19, %s909_s20  }
  0x54   :  { %899 = dma.done.wait [#allocation3], 128  }
  0x55   :  { %900 = vsyncadd [#allocation3], 4294967168 }
  0x56   :  { %901 = dma.done.wait [#allocation6], 2048  }
  0x57   :  { %902 = vsyncadd [#allocation6], 4294965248 }
  0x58   :  { %903 = dma.done.wait [#allocation9], 2048  }
  0x59   :  { %904 = vsyncadd [#allocation9], 4294965248  ;;  %v914_v0 = vmov 0.0   ;;  %vm915_vm0 = vmmov 0   ;;  %v735_v1 = vld [vmem:[#allocation5] sm:$0xff]   ;;  %v736_v2 = vld [vmem:[#allocation5 + $0x8] sm:$0xff]  }
  0x5a   :  { %645 = vmatprep.subr.bf16.mxu0 %v914_v0  ;;  %661 = vmatprep.mubr.msk.bf16.mxu0 %vm915_vm0, %v914_v0  ;;  %v737_v3 = vld [vmem:[#allocation5 + $0x10] sm:$0xff]   ;;  %v743_v4 = vld [vmem:[#allocation7] sm:$0xff]   ;;  %v738_v5 = vld [vmem:[#allocation5 + $0x18] sm:$0xff]   ;;  %s916_s11 = smov [#allocation11]  }
  0x5b   :  { %665 = vmatprep.subr.bf16.mxu1 %v914_v0  ;;  %681 = vmatprep.mubr.msk.bf16.mxu1 %vm915_vm0, %v914_v0  ;;  %v744_v6 = vld [vmem:[#allocation7 + $0x8] sm:$0xff]   ;;  %v739_v7 = vld [vmem:[#allocation5 + $0x20] sm:$0xff]   ;;  %v745_v8 = vld [vmem:[#allocation7 + $0x10] sm:$0xff]   ;;  %s562_s12 = sshll.u32 %s916_s11, 4  ;;  %s563_s12 = int_to_ptr.vmem [resolvable:$true] %s562_s12 }
  0x5c   :  { %646 = vmatpush3.bf16.msra.mxu0 %v735_v1  ;;  %666 = vmatpush3.bf16.msra.mxu1 %v743_v4  ;;  %v740_v9 = vld [vmem:[#allocation5 + $0x28] sm:$0xff]   ;;  %v746_v10 = vld [vmem:[#allocation7 + $0x18] sm:$0xff]   ;;  %v741_v11 = vld [vmem:[#allocation5 + $0x30] sm:$0xff]   ;;  %p882_p13 = scmp.lt.s32.totalorder %s563_s12, %s563_s12 }
  0x5d   :  { %647 = vmatprep.subr.bf16.mxu0 %v914_v0  ;;  %667 = vmatprep.subr.bf16.mxu1 %v914_v0  ;;  %v747_v12 = vld [vmem:[#allocation7 + $0x20] sm:$0xff]   ;;  %v742_v13 = vld [vmem:[#allocation5 + $0x38] sm:$0xff]   ;;  %v748_v15 = vld [vmem:[#allocation7 + $0x28] sm:$0xff]  }
  0x5e   :  { %v100_v14 = vld [vmem:[#allocation2] sm:$0xff]  ;;  %v749_v17 = vld [vmem:[#allocation7 + $0x30] sm:$0xff]   ;;  %v751_v19 = vld [vmem:[#allocation8] sm:$0xff]  }
  0x5f   :  { %v101_v16 = vpack.c.bf16 %v100_v14, %v100_v14  ;;  %v750_v18 = vld [vmem:[#allocation7 + $0x38] sm:$0xff]   ;;  %v752_v20 = vld [vmem:[#allocation8 + $0x8] sm:$0xff]   ;;  %v753_v21 = vld [vmem:[#allocation8 + $0x10] sm:$0xff]  }
  0x60   :  { %648 = vmatpush3.bf16.msra.mxu0 %v736_v2  ;;  %668 = vmatpush3.bf16.msra.mxu1 %v744_v6  ;;  %v754_v22 = vld [vmem:[#allocation8 + $0x18] sm:$0xff]   ;;  %v755_v23 = vld [vmem:[#allocation8 + $0x20] sm:$0xff]   ;;  %v756_v24 = vld [vmem:[#allocation8 + $0x28] sm:$0xff]  }
  0x61   :  { %649 = vmatprep.subr.bf16.mxu0 %v914_v0  ;;  %669 = vmatprep.subr.bf16.mxu1 %v914_v0  ;;  %v573_v25 = vld [vmem:[%s1105_s2] ss:$0 sm:$0xff]  ;;  %v757_v34 = vld [vmem:[#allocation8 + $0x30] sm:$0xff]   ;;  %v759_v36 = vld [vmem:[#allocation10] sm:$0xff]  }
  0x62   :  { %v758_v35 = vld [vmem:[#allocation8 + $0x38] sm:$0xff]   ;;  %v760_v37 = vld [vmem:[#allocation10 + $0x8] sm:$0xff]   ;;  %v761_v38 = vld [vmem:[#allocation10 + $0x10] sm:$0xff]  }
  0x63   :  { %v762_v39 = vld [vmem:[#allocation10 + $0x18] sm:$0xff]   ;;  %v763_v40 = vld [vmem:[#allocation10 + $0x20] sm:$0xff]   ;;  %v764_v41 = vld [vmem:[#allocation10 + $0x28] sm:$0xff]  }
  0x64   :  { %650 = vmatpush3.bf16.msra.mxu0 %v737_v3  ;;  %670 = vmatpush3.bf16.msra.mxu1 %v745_v8  ;;  %v582_v42 = vld [vmem:[%s1107_s4] ss:$0 sm:$0xff]  ;;  %v765_v51 = vld [vmem:[#allocation10 + $0x30] sm:$0xff]  }
  0x65   :  { %651 = vmatprep.subr.bf16.mxu0 %v914_v0  ;;  %671 = vmatprep.subr.bf16.mxu1 %v914_v0  ;;  %v766_v52 = vld [vmem:[#allocation10 + $0x38] sm:$0xff]  }
  0x66   :  { %v591_v53 = vld [vmem:[%s1109_s6] ss:$0 sm:$0xff]  ;;  %s877_s6 = scalar_lea.vmem %s563_s12, 128 }
  0x67   :  { %v600_v62 = vld [vmem:[%s1111_s8] ss:$0 sm:$0xff]  ;;  %p878_p12 = scmp.ne.s32.totalorder %s563_s12, %s877_s6  ;;  %p883_p0 = scmp.lt.s32.totalorder %s877_s6, %s877_s6 }
  0x68   :  { %652 = vmatpush3.bf16.msra.mxu0 %v738_v5  ;;  %672 = vmatpush3.bf16.msra.mxu1 %v746_v10 }
  0x69   :  { %653 = vmatprep.subr.bf16.mxu0 %v914_v0  ;;  %673 = vmatprep.subr.bf16.mxu1 %v914_v0  ;;  %p884_p1 = por %p883_p0, %p882_p13 }
  0x6b   :  { %p885_p2 = pnand %p884_p1, %p878_p12 }
  0x6c   :  { %654 = vmatpush3.bf16.msra.mxu0 %v739_v7  ;;  %674 = vmatpush3.bf16.msra.mxu1 %v747_v12 }
  0x6d   :  { %655 = vmatprep.subr.bf16.mxu0 %v914_v0  ;;  %675 = vmatprep.subr.bf16.mxu1 %v914_v0 }
  0x70   :  { %656 = vmatpush3.bf16.msra.mxu0 %v740_v9  ;;  %676 = vmatpush3.bf16.msra.mxu1 %v748_v15 }
  0x71   :  { %657 = vmatprep.subr.bf16.mxu0 %v914_v0  ;;  %677 = vmatprep.subr.bf16.mxu1 %v914_v0 }
  0x74   :  { %658 = vmatpush3.bf16.msra.mxu0 %v741_v11  ;;  %678 = vmatpush3.bf16.msra.mxu1 %v749_v17 }
  0x75   :  { %659 = vmatprep.subr.bf16.mxu0 %v914_v0  ;;  %679 = vmatprep.subr.bf16.mxu1 %v914_v0 }
  0x78   :  { %660 = vmatpush3.bf16.msra.mxu0 %v742_v13  ;;  %680 = vmatpush3.bf16.msra.mxu1 %v750_v18 }
  0x79   :  { %685 = vmatprep.subr.bf16.mxu0 %v914_v0  ;;  %705 = vmatprep.subr.bf16.mxu1 %v914_v0 }
  0x7b   :  { %662 = vmatmul.mubr.bf16.vlgmr.msra.gmra.mrb[0].mxu0 %v101_v16 }
  0x7c   :  { %701 = vmatprep.mubr.msk.bf16.mxu0 %vm915_vm0, %v914_v0  ;;  %686 = vmatpush3.bf16.msra.mxu0 %v751_v19 }
  0x7d   :  { %687 = vmatprep.subr.bf16.mxu0 %v914_v0 }
  0x80   :  { %688 = vmatpush3.bf16.msra.mxu0 %v752_v20 }
  0x81   :  { %689 = vmatprep.subr.bf16.mxu0 %v914_v0 }
  0x84   :  { %690 = vmatpush3.bf16.msra.mxu0 %v753_v21 }
  0x85   :  { %691 = vmatprep.subr.bf16.mxu0 %v914_v0 }
  0x88   :  { %692 = vmatpush3.bf16.msra.mxu0 %v754_v22 }
  0x89   :  { %693 = vmatprep.subr.bf16.mxu0 %v914_v0 }
  0x8c   :  { %694 = vmatpush3.bf16.msra.mxu0 %v755_v23 }
  0x8d   :  { %695 = vmatprep.subr.bf16.mxu0 %v914_v0 }
  0x90   :  { %696 = vmatpush3.bf16.msra.mxu0 %v756_v24 }
  0x91   :  { %697 = vmatprep.subr.bf16.mxu0 %v914_v0 }
  0x94   :  { %698 = vmatpush3.bf16.msra.mxu0 %v757_v34 }
  0x95   :  { %699 = vmatprep.subr.bf16.mxu0 %v914_v0 }
  0x98   :  { %700 = vmatpush3.bf16.msra.mxu0 %v758_v35 }
 0x14e   :  { %v207_v26 = vpop.f32.mrb[0].mxu0 }
 0x14f   :  { %v208_v27 = vadd.f32 %v573_v25, %v207_v26  ;;  %v663_v28 = vpop.f32.mrb[1].mxu0 }
 0x150   :  { %v210_v29 = vpop.f32.mrb[2].mxu0 }
 0x151   :  { %v213_v30 = vmax.f32 %v208_v27, 0.0  ;;  %v664_v31 = vpop.f32.mrb[3].mxu0 }
 0x153   :  { %v214_v32 = vadd.f32 %v213_v30, %v100_v14 }
 0x155   :  { %v215_v33 = vpack.c.bf16 %v214_v32, %v214_v32 }
 0x157   :  { %682 = vmatmul.mubr.bf16.vlgmr.msra.gmra.mrb[0].mxu1 %v215_v33 }
 0x158   :  { %721 = vmatprep.mubr.msk.bf16.mxu1 %vm915_vm0, %v914_v0  ;;  %706 = vmatpush3.bf16.msra.mxu1 %v759_v36 }
 0x159   :  { %707 = vmatprep.subr.bf16.mxu1 %v914_v0 }
 0x15c   :  { %708 = vmatpush3.bf16.msra.mxu1 %v760_v37 }
 0x15d   :  { %709 = vmatprep.subr.bf16.mxu1 %v914_v0 }
 0x160   :  { %710 = vmatpush3.bf16.msra.mxu1 %v761_v38 }
 0x161   :  { %711 = vmatprep.subr.bf16.mxu1 %v914_v0 }
 0x164   :  { %712 = vmatpush3.bf16.msra.mxu1 %v762_v39 }
 0x165   :  { %713 = vmatprep.subr.bf16.mxu1 %v914_v0 }
 0x168   :  { %714 = vmatpush3.bf16.msra.mxu1 %v763_v40 }
 0x169   :  { %715 = vmatprep.subr.bf16.mxu1 %v914_v0 }
 0x16c   :  { %716 = vmatpush3.bf16.msra.mxu1 %v764_v41 }
 0x16d   :  { %717 = vmatprep.subr.bf16.mxu1 %v914_v0 }
 0x170   :  { %718 = vmatpush3.bf16.msra.mxu1 %v765_v51 }
 0x171   :  { %719 = vmatprep.subr.bf16.mxu1 %v914_v0 }
 0x174   :  { %720 = vmatpush3.bf16.msra.mxu1 %v766_v52 }
 0x22a   :  { %v321_v43 = vpop.f32.mrb[0].mxu1 }
 0x22b   :  { %v322_v44 = vadd.f32 %v582_v42, %v321_v43  ;;  %v683_v45 = vpop.f32.mrb[1].mxu1 }
 0x22c   :  { %v324_v46 = vpop.f32.mrb[2].mxu1 }
 0x22d   :  { %v327_v47 = vmax.f32 %v322_v44, 0.0  ;;  %v684_v48 = vpop.f32.mrb[3].mxu1 }
 0x22f   :  { %v328_v49 = vadd.f32 %v327_v47, %v214_v32 }
 0x231   :  { %v329_v50 = vpack.c.bf16 %v328_v49, %v328_v49 }
 0x233   :  { %702 = vmatmul.mubr.bf16.vlgmr.msra.gmra.mrb[4].mxu0 %v329_v50 }
 0x306   :  { %v435_v54 = vpop.f32.mrb[4].mxu0 }
 0x307   :  { %v436_v55 = vadd.f32 %v591_v53, %v435_v54  ;;  %v703_v56 = vpop.f32.mrb[5].mxu0 }
 0x308   :  { %v438_v57 = vpop.f32.mrb[6].mxu0 }
 0x309   :  { %v441_v58 = vmax.f32 %v436_v55, 0.0  ;;  %v704_v59 = vpop.f32.mrb[7].mxu0 }
 0x30b   :  { %v442_v60 = vadd.f32 %v441_v58, %v328_v49 }
 0x30d   :  { %v443_v61 = vpack.c.bf16 %v442_v60, %v442_v60 }
 0x30f   :  { %722 = vmatmul.mubr.bf16.vlgmr.msra.gmra.mrb[4].mxu1 %v443_v61 }
 0x3e2   :  { %v549_v63 = vpop.f32.mrb[4].mxu1 }
 0x3e3   :  { %v550_v0 = vadd.f32 %v600_v62, %v549_v63  ;;  %v723_v1 = vpop.f32.mrb[5].mxu1 }
 0x3e4   :  { %v552_v2 = vpop.f32.mrb[6].mxu1 }
 0x3e5   :  { %555 = vst [vmem:[#allocation11] sm:$0xff] %v550_v0  ;;  %v724_v3 = vpop.f32.mrb[7].mxu1 }
 0x3e6   :  { %888 = shalt.err (!%p885_p2)
}
 0x3e7   :  { %s889_s8 = scalar_lea.hbm %s1112_s9, 128 }
 0x3e8   :  { %p890_p3 = scmp.ne.s32.totalorder %s1112_s9, %s889_s8  ;;  %p893_p4 = scmp.lt.u32.totalorder %s889_s8, %s1112_s9 }
 0x3ea   :  { %p895_p5 = pnand %p893_p4, %p890_p3 }
 0x3ec   :  { %898 = shalt.err (!%p895_p5)
}
 0x3ed   :  { %565 = dma.vmem_to_hbm [thread:$0]  %s563_s12, 128, %s1112_s9, [#allocation4]  }
 0x3ee   :  { %905 = dma.done.wait [#allocation4], 128  }
 0x3ef   :  { %906 = vsyncadd [#allocation4], 4294967168 }
 0x3f0   :  { %569 = vsyncpa [#allocation3], 1 }
 0x3f1   :  { %570 = vsyncpa [#allocation6], 1 }
 0x3f2   :  { %571 = vsyncpa [#allocation9], 1 }
 0x3f3   :  { %572 = vsyncpa [#allocation4], 1 }

</bundles_post_ra>
